<compile_context>
chip_gen: v7x
topology: tpu7x:2x2x1
jax: 0.10.0
libtpu: 0.0.40
codegen_flags: <defaults>
</compile_context>

<pallas_src>
import jax
import jax.numpy as jnp
from jax.experimental import pallas as pl
from jax.experimental.pallas import tpu as pltpu

# ~4 MiB per buffer; in + out, each double-buffered => ~16 MiB VMEM.
_TARGET_TILE_BYTES = 4 * 1024 * 1024
# Explicit scoped-VMEM limit (don't rely on per-generation defaults).
_VMEM_LIMIT_BYTES = 32 * 1024 * 1024
# Guard for degenerate ragged shapes (single block would not fit VMEM).
_MAX_SINGLE_BLOCK_BYTES = 16 * 1024 * 1024


def _relu_kernel(x_ref, o_ref):
    # Pure VPU elementwise op on the current VMEM tile; kernel is HBM-bound.
    o_ref[...] = jnp.maximum(x_ref[...], 0)


def _sublane_multiple(itemsize: int) -> int:
    # Sub-32-bit dtypes pack along sublanes: 8 (f32), 16 (bf16), 32 (int8/fp8).
    return {4: 8, 2: 16, 1: 32}.get(itemsize, 8)


def _pick_block_rows(rows: int, width: int, itemsize: int) -> int:
    sublane = _sublane_multiple(itemsize)
    block_rows = _TARGET_TILE_BYTES // max(1, width * itemsize)
    block_rows = max(sublane, (block_rows // sublane) * sublane)
    # v7x: guarantee >=2 grid blocks whenever the row count allows it so both
    # TensorCores get work under dimension_semantics=("parallel",).
    if rows >= 2 * sublane:
        half = pl.cdiv(rows, 2)
        half = ((half + sublane - 1) // sublane) * sublane
        block_rows = min(block_rows, half)
    if block_rows >= rows:
        block_rows = rows  # full-extent block: always a legal block shape
    return block_rows


def _call_relu_2d(x2d: jax.Array, block_rows: int) -> jax.Array:
    rows, width = x2d.shape
    itemsize = jnp.dtype(x2d.dtype).itemsize
    grid = (pl.cdiv(rows, block_rows),)
    return pl.pallas_call(
        _relu_kernel,
        out_shape=jax.ShapeDtypeStruct((rows, width), x2d.dtype),
        grid_spec=pltpu.PrefetchScalarGridSpec(
            num_scalar_prefetch=0,
            grid=grid,
            in_specs=[pl.BlockSpec((block_rows, width), lambda i: (i, 0))],
            out_specs=pl.BlockSpec((block_rows, width), lambda i: (i, 0)),
        ),
        compiler_params=pltpu.CompilerParams(
            # Parallel row axis: lets Mosaic shard blocks across v7x's 2 TCs.
            dimension_semantics=("parallel",),
            vmem_limit_bytes=_VMEM_LIMIT_BYTES,
        ),
        cost_estimate=pl.CostEstimate(
            flops=rows * width,
            bytes_accessed=2 * rows * width * itemsize,
            transcendentals=0,
        ),
    )(x2d)


def pallas_relu(x: jax.Array) -> jax.Array:
    """ReLU via a Pallas TPU kernel. Works for arbitrary input shapes/dtypes."""
    orig_shape = x.shape
    dtype = x.dtype
    total = x.size
    if total == 0:
        return x

    itemsize = jnp.dtype(dtype).itemsize

    # Fast path: element count divisible by 128 -> free flat reshape into a
    # lane-dense slab (contiguous HBM, unmasked vector stores).
    if total % 128 == 0:
        width = next(w for w in (1024, 512, 256, 128) if total % w == 0)
        rows = total // width
        x2d = jnp.ravel(x).reshape(rows, width)
        block_rows = _pick_block_rows(rows, width, itemsize)
        out2d = _call_relu_2d(x2d, block_rows)
        return out2d.reshape(orig_shape)

    # Ragged path (no pad/slice copies): run on a (leading_rows, last_dim)
    # view. The full last dim is a legal full-extent block dim for any size;
    # tail row stores are masked, which is fine for elementwise ops.
    last = orig_shape[-1] if x.ndim >= 1 else 1
    rows = total // last
    sublane = _sublane_multiple(itemsize)
    min_block_bytes = min(rows, sublane) * last * itemsize
    if min_block_bytes <= _MAX_SINGLE_BLOCK_BYTES:
        x2d = x.reshape(rows, last)
        block_rows = _pick_block_rows(rows, last, itemsize)
        out2d = _call_relu_2d(x2d, block_rows)
        return out2d.reshape(orig_shape)

    # Degenerate fallback (huge last dim that is not a multiple of 128):
    # pad the flat array to a lane-dense width, run, then slice.
    width = 1024
    padded = pl.cdiv(total, width) * width
    flat = jnp.pad(jnp.ravel(x), (0, padded - total))
    rows = padded // width
    x2d = flat.reshape(rows, width)
    block_rows = _pick_block_rows(rows, width, itemsize)
    out2d = _call_relu_2d(x2d, block_rows)
    return out2d.reshape(-1)[:total].reshape(orig_shape)


if __name__ == "__main__":
    # Deterministic small input consistent with an NCHW conv-style tensor.
    key = jax.random.PRNGKey(0)
    x = jax.random.normal(key, (2, 4, 16, 16), dtype=jnp.float32)  # NCHW

    y = pallas_relu(x)
    y = jax.block_until_ready(y)

    # Correctness check against plain JAX reference.
    y_ref = jnp.maximum(x, 0.0)
    assert y.shape == x.shape and y.dtype == x.dtype
    assert jnp.allclose(y, y_ref), "mismatch vs reference ReLU"

    # Exercise the ragged (non-multiple-of-128) path as well.
    x_odd = jax.random.normal(jax.random.PRNGKey(1), (3, 5, 7), dtype=jnp.float32)
    y_odd = jax.block_until_ready(pallas_relu(x_odd))
    assert y_odd.shape == x_odd.shape and y_odd.dtype == x_odd.dtype
    assert jnp.allclose(y_odd, jnp.maximum(x_odd, 0.0)), "mismatch on ragged path"

    # A larger divisible shape that exercises the multi-block (>=2 blocks) path.
    x_big = jax.random.normal(jax.random.PRNGKey(2), (8, 16, 32, 32), dtype=jnp.bfloat16)
    y_big = jax.block_until_ready(pallas_relu(x_big))
    assert y_big.shape == x_big.shape and y_big.dtype == x_big.dtype
    assert jnp.allclose(
        y_big.astype(jnp.float32), jnp.maximum(x_big, 0).astype(jnp.float32)
    ), "mismatch on multi-block path"

    print("KERNEL_OK")
</pallas_src>

<mosaic_0001>
module attributes {stable_mosaic.version = 11 : i64} {
  func.func @_relu_kernel(%arg0: i32, %arg1: memref<2x1024xf32, #tpu.memory_space<vmem>>, %arg2: memref<2x1024xf32, #tpu.memory_space<vmem>>) attributes {dimension_semantics = [#tpu.dimension_semantics<parallel>], iteration_bounds = array<i64: 1>, scalar_prefetch = 0 : i64, scratch_operands = 0 : i64, tpu.core_type = #tpu.core_type<tc>, window_params = [{transform_indices = @transform_0, window_bounds = array<i64: 2, 1024>}, {transform_indices = @transform_1, window_bounds = array<i64: 2, 1024>}]} {
    %c0 = arith.constant 0 : index
    %c0_0 = arith.constant 0 : index
    %0 = vector.load %arg1[%c0, %c0_0] : memref<2x1024xf32, #tpu.memory_space<vmem>>, vector<2x1024xf32>
    %cst = arith.constant 0.000000e+00 : f32
    %1 = vector.broadcast %cst : f32 to vector<2x1024xf32>
    %2 = arith.maximumf %0, %1 : vector<2x1024xf32>
    %c0_1 = arith.constant 0 : index
    %c0_2 = arith.constant 0 : index
    %3 = vector.load %arg2[%c0_1, %c0_2] : memref<2x1024xf32, #tpu.memory_space<vmem>>, vector<2x1024xf32>
    tpu.vector_store %arg2[%c0_1, %c0_2], %2 {strides = array<i32>} : memref<2x1024xf32, #tpu.memory_space<vmem>>, vector<2x1024xf32>,
    return
  }
  func.func @transform_0(%arg0: i32) -> (i32, i32) {
    %c0_i32 = arith.constant 0 : i32
    %c0_i32_0 = arith.constant 0 : i32
    return %arg0, %c0_i32 : i32, i32
  }
  func.func @transform_1(%arg0: i32) -> (i32, i32) {
    %c0_i32 = arith.constant 0 : i32
    %c0_i32_0 = arith.constant 0 : i32
    return %arg0, %c0_i32 : i32, i32
  }
}

</mosaic_0001>

<bundles_post_ra>
// kernel: tpu_custom_call.1
= control target key start
LH: loop header
LB: loop body
LE: loop exit
PB: predicated region body
PF: predicated region fallthrough
CT: control target
= control target key end

     0   :  { %6 = vsyncpa [#allocation3], 0  ;;  %s128_s0 = inlined_call_operand.hbm [shape: f32[2,1024], index: 0, kind: input, shape index: {}]   ;;  %s129_s1 = inlined_call_operand.hbm [shape: f32[2,1024], index: 1, kind: output, shape index: {}]  }
   0x1   :  { %7 = vsyncpa [#allocation4], 0  ;;  %s92_s6 = smov [#allocation2]   ;;  %s44_s10 = scalar_lea.hbm %s128_s0, 256 }
   0x2   :  { %s14_s7 = sshll.u32 %s92_s6, 4  ;;  %p45_p0 = scmp.ne.s32.totalorder %s128_s0, %s44_s10  ;;  %s15_s7 = int_to_ptr.vmem [resolvable:$true] %s14_s7 }
   0x3   :  { %p48_p1 = scmp.lt.u32.totalorder %s44_s10, %s128_s0 }
   0x5   :  { %p50_p2 = pnand %p48_p1, %p45_p0 }
   0x7   :  { %53 = shalt.err (!%p50_p2)
}
   0x8   :  { %s54_s15 = scalar_lea.vmem %s15_s7, 256  ;;  %p59_p4 = scmp.lt.s32.totalorder %s15_s7, %s15_s7 }
   0x9   :  { %p55_p3 = scmp.ne.s32.totalorder %s15_s7, %s54_s15  ;;  %p60_p5 = scmp.lt.s32.totalorder %s54_s15, %s54_s15 }
   0xb   :  { %p61_p6 = por %p60_p5, %p59_p4 }
   0xd   :  { %p62_p7 = pnand %p61_p6, %p55_p3 }
   0xf   :  { %65 = shalt.err (!%p62_p7)
}
  0x10   :  { %17 = dma.hbm_to_vmem [thread:$0]  %s128_s0, 256, %s15_s7, [#allocation3]  }
  0x11   :  { %88 = dma.done.wait [#allocation3], 256  }
  0x12   :  { %89 = vsyncadd [#allocation3], 4294967040  ;;  %s93_s18 = smov [#allocation5]   ;;  %v21_v0 = vld [vmem:[#allocation2] sm:$0xff]  ;;  %v22_v1 = vld [vmem:[#allocation2 + $0x8] sm:$0xff] }
  0x13   :  { %s33_s19 = sshll.u32 %s93_s18, 4  ;;  %v23_v2 = vmax.f32 %v21_v0, 0.0  ;;  %v24_v3 = vmax.f32 %v22_v1, 0.0  ;;  %s34_s19 = int_to_ptr.vmem [resolvable:$true] %s33_s19 }
  0x14   :  { %s66_s20 = scalar_lea.vmem %s34_s19, 256  ;;  %p71_p9 = scmp.lt.s32.totalorder %s34_s19, %s34_s19 }
  0x15   :  { %25 = vst [vmem:[#allocation5] sm:$0xff] %v23_v2  ;;  %26 = vst [vmem:[#allocation5 + $0x8] sm:$0xff] %v24_v3  ;;  %p67_p8 = scmp.ne.s32.totalorder %s34_s19, %s66_s20  ;;  %p72_p10 = scmp.lt.s32.totalorder %s66_s20, %s66_s20 }
  0x17   :  { %p73_p11 = por %p72_p10, %p71_p9 }
  0x19   :  { %p74_p12 = pnand %p73_p11, %p67_p8 }
  0x1b   :  { %77 = shalt.err (!%p74_p12)
}
  0x1c   :  { %s78_s22 = scalar_lea.hbm %s129_s1, 256 }
  0x1d   :  { %p79_p13 = scmp.ne.s32.totalorder %s129_s1, %s78_s22  ;;  %p82_p0 = scmp.lt.u32.totalorder %s78_s22, %s129_s1 }
  0x1f   :  { %p84_p1 = pnand %p82_p0, %p79_p13 }
  0x21   :  { %87 = shalt.err (!%p84_p1)
}
  0x22   :  { %36 = dma.vmem_to_hbm [thread:$0]  %s34_s19, 256, %s129_s1, [#allocation4]  }
  0x23   :  { %90 = dma.done.wait [#allocation4], 256  }
  0x24   :  { %91 = vsyncadd [#allocation4], 4294967040 }
  0x25   :  { %40 = vsyncpa [#allocation3], 1 }
  0x26   :  { %41 = vsyncpa [#allocation4], 1 }

</bundles_post_ra>
